<compile_context>
chip_gen: v7x
topology: tpu7x:2x2x1
jax: 0.10.0
libtpu: 0.0.40
codegen_flags: <defaults>
</compile_context>

<pallas_src>
import jax
import jax.numpy as jnp
from jax.experimental import pallas as pl
from jax.experimental.pallas import tpu as pltpu

# HIVPatient env: observation dim 6, 4 discrete actions.
STATE_SIZE = 6
ACTION_SIZE = 4
H1, H2 = 256, 128

STATE_PAD = 8        # fc1 K padded to the sublane multiple
OUT_PAD = 128        # lane-dense head width (value block and advantage block)
MAX_TILE = 256       # max batch-tile rows per grid step


def _round_up(n, m):
    return ((n + m - 1) // m) * m


def _dueling_kernel(x_ref, w1_ref, b1_ref, w2_ref, b2_ref, wh_ref, bh_ref,
                    q_ref, advsum_ref):
    # fc1 + ReLU in f32 (precision-safe for raw HIV features; K=8 so it is cheap).
    h = jnp.dot(x_ref[...], w1_ref[...],
                preferred_element_type=jnp.float32) + b1_ref[...]
    h = jnp.maximum(h, 0.0)

    # fc2 + ReLU: bf16 MXU matmul, f32 accumulate, f32 epilogue (VPU-safe on v5e).
    h = jnp.dot(h.astype(jnp.bfloat16), w2_ref[...],
                preferred_element_type=jnp.float32) + b2_ref[...]
    h = jnp.maximum(h, 0.0)
    hb = h.astype(jnp.bfloat16)

    # Fused heads: (TB, 256) = [ value replicated across 128 lanes | advantage padded ].
    heads = jnp.dot(hb, wh_ref[...],
                    preferred_element_type=jnp.float32) + bh_ref[...]
    value = heads[:, :OUT_PAD]          # every lane holds V(s)        (tile-aligned slice)
    adv = heads[:, OUT_PAD:]            # cols >= ACTION_SIZE are zero (tile-aligned slice)

    # Q without the global mean (subtracted in the wrapper after the cross-tile reduce).
    q_ref[...] = (value + adv).astype(q_ref.dtype)
    # Per-row advantage sum; padded advantage columns contribute exactly 0.
    advsum_ref[...] = jnp.sum(adv, axis=1, keepdims=True)


def qnetwork_forward(x, params):
    """x: (B, STATE_SIZE) float32. Returns (B, ACTION_SIZE) float32 Q-values."""
    B, s = x.shape
    assert s == STATE_SIZE

    # Pad batch to a multiple of 8 (unmasked stores), then to a multiple of the tile.
    b8 = _round_up(B, 8)
    tb = min(MAX_TILE, b8)
    bp = _round_up(b8, tb)
    grid = (bp // tb,)

    x_p = jnp.zeros((bp, STATE_PAD), jnp.float32).at[:B, :STATE_SIZE].set(
        x.astype(jnp.float32))

    row_spec = lambda shape: pl.BlockSpec(shape, lambda i: (i, 0))   # tiled over batch
    res_spec = lambda shape: pl.BlockSpec(shape, lambda i: (0, 0))   # resident weights

    q_raw, adv_rowsum = pl.pallas_call(
        _dueling_kernel,
        out_shape=(jax.ShapeDtypeStruct((bp, OUT_PAD), jnp.float32),
                   jax.ShapeDtypeStruct((bp, 1), jnp.float32)),
        grid_spec=pltpu.PrefetchScalarGridSpec(
            num_scalar_prefetch=0,
            grid=grid,
            in_specs=[
                row_spec((tb, STATE_PAD)),        # x tile
                res_spec((STATE_PAD, H1)),        # w1 (f32)
                res_spec((1, H1)),                # b1
                res_spec((H1, H2)),               # w2 (bf16)
                res_spec((1, H2)),                # b2
                res_spec((H2, 2 * OUT_PAD)),      # fused head weight (bf16)
                res_spec((1, 2 * OUT_PAD)),       # fused head bias
            ],
            out_specs=[
                row_spec((tb, OUT_PAD)),          # value + advantage (lane-dense)
                row_spec((tb, 1)),                # per-row advantage sums
            ],
        ),
        compiler_params=pltpu.CompilerParams(
            dimension_semantics=("parallel",)),
    )(x_p, params["w1"], params["b1"], params["w2"], params["b2"],
      params["wh"], params["bh"])

    # Global advantage mean over the REAL rows / actions only, subtracted in XLA.
    adv_mean = jnp.sum(adv_rowsum[:B]) / jnp.float32(B * ACTION_SIZE)
    return q_raw[:B, :ACTION_SIZE] - adv_mean


def init_params(key):
    """Mimic _init_weights: kaiming_normal_(relu) weights, zero biases. Raw layout."""
    def kaiming(k, fan_in, fan_out):
        std = jnp.sqrt(jnp.float32(2.0) / jnp.float32(fan_in))
        return std * jax.random.normal(k, (fan_in, fan_out), jnp.float32)

    k1, k2, k3, k4 = jax.random.split(key, 4)
    return {
        "w1": kaiming(k1, STATE_SIZE, H1), "b1": jnp.zeros((H1,), jnp.float32),
        "w2": kaiming(k2, H1, H2),         "b2": jnp.zeros((H2,), jnp.float32),
        "wv": kaiming(k3, H2, 1),          "bv": jnp.zeros((1,), jnp.float32),
        "wa": kaiming(k4, H2, ACTION_SIZE),"ba": jnp.zeros((ACTION_SIZE,), jnp.float32),
    }


def pack_params(raw):
    """Pack raw (in, out) weights into the TPU-friendly fused layout.

    Works for imported trained weights too: bv is replicated across all 128 value
    lanes and advantage columns >= ACTION_SIZE (weights AND bias) stay exactly zero,
    so the sum-based mean is never polluted.
    """
    w1_p = jnp.zeros((STATE_PAD, H1), jnp.float32).at[:STATE_SIZE, :].set(raw["w1"])

    wv_rep = jnp.broadcast_to(raw["wv"], (H2, OUT_PAD))
    wa_pad = jnp.zeros((H2, OUT_PAD), jnp.float32).at[:, :ACTION_SIZE].set(raw["wa"])
    wh = jnp.concatenate([wv_rep, wa_pad], axis=1).astype(jnp.bfloat16)

    bv_rep = jnp.broadcast_to(raw["bv"], (OUT_PAD,))
    ba_pad = jnp.zeros((OUT_PAD,), jnp.float32).at[:ACTION_SIZE].set(raw["ba"])
    bh = jnp.concatenate([bv_rep, ba_pad])[None, :]

    return {
        "w1": w1_p,                                # f32: fc1 kept full precision
        "b1": raw["b1"][None, :],
        "w2": raw["w2"].astype(jnp.bfloat16),
        "b2": raw["b2"][None, :],
        "wh": wh,
        "bh": bh,
    }


def _reference_forward(x, raw):
    """Pure-JAX reference with the same numeric path (f32 fc1, bf16 fc2/heads)."""
    h = jnp.maximum(
        jnp.dot(x.astype(jnp.float32), raw["w1"],
                preferred_element_type=jnp.float32) + raw["b1"], 0.0)
    h = jnp.maximum(
        jnp.dot(h.astype(jnp.bfloat16), raw["w2"].astype(jnp.bfloat16),
                preferred_element_type=jnp.float32) + raw["b2"], 0.0)
    hb = h.astype(jnp.bfloat16)
    value = jnp.dot(hb, raw["wv"].astype(jnp.bfloat16),
                    preferred_element_type=jnp.float32) + raw["bv"]
    adv = jnp.dot(hb, raw["wa"].astype(jnp.bfloat16),
                  preferred_element_type=jnp.float32) + raw["ba"]
    return value + adv - jnp.mean(adv)      # global (batch + action) mean, per module


if __name__ == "__main__":
    key = jax.random.PRNGKey(0)
    kp, kx_small, kx_big = jax.random.split(key, 3)

    raw = init_params(kp)
    params = pack_params(raw)

    # Small inference-style batch (B=2; padded to 8 inside the wrapper -> single tile).
    x = jax.random.normal(kx_small, (2, STATE_SIZE), jnp.float32)
    out = jax.block_until_ready(qnetwork_forward(x, params))
    ref = _reference_forward(x, raw)
    assert out.shape == (2, ACTION_SIZE)
    assert jnp.allclose(out, ref, atol=1e-2, rtol=1e-2), "mismatch vs reference (B=2)"

    # Replay-style batch exercising the batch grid (2 tiles) + cross-tile mean reduce.
    xb = jax.random.normal(kx_big, (272, STATE_SIZE), jnp.float32)
    outb = jax.block_until_ready(qnetwork_forward(xb, params))
    refb = _reference_forward(xb, raw)
    assert outb.shape == (272, ACTION_SIZE)
    assert jnp.allclose(outb, refb, atol=1e-2, rtol=1e-2), "mismatch vs reference (B=272)"

    print("KERNEL_OK")
</pallas_src>

<mosaic_0001>
module attributes {stable_mosaic.version = 11 : i64} {
  func.func @_dueling_kernel(%arg0: i32, %arg1: memref<8x8xf32, #tpu.memory_space<vmem>>, %arg2: memref<8x256xf32, #tpu.memory_space<vmem>>, %arg3: memref<1x256xf32, #tpu.memory_space<vmem>>, %arg4: memref<256x128xbf16, #tpu.memory_space<vmem>>, %arg5: memref<1x128xf32, #tpu.memory_space<vmem>>, %arg6: memref<128x256xbf16, #tpu.memory_space<vmem>>, %arg7: memref<1x256xf32, #tpu.memory_space<vmem>>, %arg8: memref<8x128xf32, #tpu.memory_space<vmem>>, %arg9: memref<8x1xf32, #tpu.memory_space<vmem>>) attributes {dimension_semantics = [#tpu.dimension_semantics<parallel>], iteration_bounds = array<i64: 1>, scalar_prefetch = 0 : i64, scratch_operands = 0 : i64, tpu.core_type = #tpu.core_type<tc>, window_params = [{transform_indices = @transform_0, window_bounds = array<i64: 8, 8>}, {pipeline_mode = #tpu.pipeline_mode<synchronous>, transform_indices = @transform_1, window_bounds = array<i64: 8, 256>}, {pipeline_mode = #tpu.pipeline_mode<synchronous>, transform_indices = @transform_2, window_bounds = array<i64: 1, 256>}, {pipeline_mode = #tpu.pipeline_mode<synchronous>, transform_indices = @transform_3, window_bounds = array<i64: 256, 128>}, {pipeline_mode = #tpu.pipeline_mode<synchronous>, transform_indices = @transform_4, window_bounds = array<i64: 1, 128>}, {pipeline_mode = #tpu.pipeline_mode<synchronous>, transform_indices = @transform_5, window_bounds = array<i64: 128, 256>}, {pipeline_mode = #tpu.pipeline_mode<synchronous>, transform_indices = @transform_6, window_bounds = array<i64: 1, 256>}, {transform_indices = @transform_7, window_bounds = array<i64: 8, 128>}, {transform_indices = @transform_8, window_bounds = array<i64: 8, 1>}]} {
    %c0 = arith.constant 0 : index
    %c0_0 = arith.constant 0 : index
    %0 = vector.load %arg1[%c0, %c0_0] : memref<8x8xf32, #tpu.memory_space<vmem>>, vector<8x8xf32>
    %c0_1 = arith.constant 0 : index
    %c0_2 = arith.constant 0 : index
    %1 = vector.load %arg2[%c0_1, %c0_2] : memref<8x256xf32, #tpu.memory_space<vmem>>, vector<8x256xf32>
    %cst = arith.constant dense<0.000000e+00> : vector<8x256xf32>
    %2 = tpu.matmul %0, %1, %cst {dimension_numbers = #tpu.dot_dimension_numbers<[1], [0], [0], [1], [0, 0, 1, 1], [], []>} : vector<8x8xf32>, vector<8x256xf32>, vector<8x256xf32> -> vector<8x256xf32>
    %c0_3 = arith.constant 0 : index
    %c0_4 = arith.constant 0 : index
    %3 = vector.load %arg3[%c0_3, %c0_4] : memref<1x256xf32, #tpu.memory_space<vmem>>, vector<1x256xf32>
    %4 = vector.broadcast %3 : vector<1x256xf32> to vector<8x256xf32>
    %5 = arith.addf %2, %4 : vector<8x256xf32>
    %cst_5 = arith.constant 0.000000e+00 : f32
    %6 = vector.broadcast %cst_5 : f32 to vector<8x256xf32>
    %7 = arith.maximumf %5, %6 : vector<8x256xf32>
    %8 = arith.truncf %7 : vector<8x256xf32> to vector<8x256xbf16>
    %c0_6 = arith.constant 0 : index
    %c0_7 = arith.constant 0 : index
    %9 = vector.load %arg4[%c0_6, %c0_7] : memref<256x128xbf16, #tpu.memory_space<vmem>>, vector<256x128xbf16>
    %cst_8 = arith.constant dense<0.000000e+00> : vector<8x128xf32>
    %10 = tpu.matmul %8, %9, %cst_8 {dimension_numbers = #tpu.dot_dimension_numbers<[1], [0], [0], [1], [0, 0, 1, 1], [], []>} : vector<8x256xbf16>, vector<256x128xbf16>, vector<8x128xf32> -> vector<8x128xf32>
    %c0_9 = arith.constant 0 : index
    %c0_10 = arith.constant 0 : index
    %11 = vector.load %arg5[%c0_9, %c0_10] : memref<1x128xf32, #tpu.memory_space<vmem>>, vector<1x128xf32>
    %12 = vector.broadcast %11 : vector<1x128xf32> to vector<8x128xf32>
    %13 = arith.addf %10, %12 : vector<8x128xf32>
    %cst_11 = arith.constant 0.000000e+00 : f32
    %14 = vector.broadcast %cst_11 : f32 to vector<8x128xf32>
    %15 = arith.maximumf %13, %14 : vector<8x128xf32>
    %16 = arith.truncf %15 : vector<8x128xf32> to vector<8x128xbf16>
    %c0_12 = arith.constant 0 : index
    %c0_13 = arith.constant 0 : index
    %17 = vector.load %arg6[%c0_12, %c0_13] : memref<128x256xbf16, #tpu.memory_space<vmem>>, vector<128x256xbf16>
    %cst_14 = arith.constant dense<0.000000e+00> : vector<8x256xf32>
    %18 = tpu.matmul %16, %17, %cst_14 {dimension_numbers = #tpu.dot_dimension_numbers<[1], [0], [0], [1], [0, 0, 1, 1], [], []>} : vector<8x128xbf16>, vector<128x256xbf16>, vector<8x256xf32> -> vector<8x256xf32>
    %c0_15 = arith.constant 0 : index
    %c0_16 = arith.constant 0 : index
    %19 = vector.load %arg7[%c0_15, %c0_16] : memref<1x256xf32, #tpu.memory_space<vmem>>, vector<1x256xf32>
    %20 = vector.broadcast %19 : vector<1x256xf32> to vector<8x256xf32>
    %21 = arith.addf %18, %20 : vector<8x256xf32>
    %22 = vector.extract_strided_slice %21 {offsets = [0, 0], sizes = [8, 128], strides = [1, 1]} : vector<8x256xf32> to vector<8x128xf32>
    %23 = vector.extract_strided_slice %21 {offsets = [0, 128], sizes = [8, 128], strides = [1, 1]} : vector<8x256xf32> to vector<8x128xf32>
    %24 = arith.addf %22, %23 : vector<8x128xf32>
    %c0_17 = arith.constant 0 : index
    %c0_18 = arith.constant 0 : index
    %25 = vector.load %arg8[%c0_17, %c0_18] : memref<8x128xf32, #tpu.memory_space<vmem>>, vector<8x128xf32>
    tpu.vector_store %arg8[%c0_17, %c0_18], %24 {strides = array<i32>} : memref<8x128xf32, #tpu.memory_space<vmem>>, vector<8x128xf32>,
    %cst_19 = arith.constant dense<0.000000e+00> : vector<8xf32>
    %26 = vector.multi_reduction <add>, %23, %cst_19 [1] : vector<8x128xf32> to vector<8xf32>
    %27 = vector.shape_cast %26 : vector<8xf32> to vector<8x1xf32>
    %c0_20 = arith.constant 0 : index
    %c0_21 = arith.constant 0 : index
    %28 = vector.load %arg9[%c0_20, %c0_21] : memref<8x1xf32, #tpu.memory_space<vmem>>, vector<8x1xf32>
    tpu.vector_store %arg9[%c0_20, %c0_21], %27 {strides = array<i32>} : memref<8x1xf32, #tpu.memory_space<vmem>>, vector<8x1xf32>,
    return
  }
  func.func @transform_0(%arg0: i32) -> (i32, i32) {
    %c0_i32 = arith.constant 0 : i32
    %c0_i32_0 = arith.constant 0 : i32
    return %arg0, %c0_i32 : i32, i32
  }
  func.func @transform_1(%arg0: i32) -> (i32, i32) {
    %c0_i32 = arith.constant 0 : i32
    %c0_i32_0 = arith.constant 0 : i32
    %c0_i32_1 = arith.constant 0 : i32
    return %c0_i32, %c0_i32_0 : i32, i32
  }
  func.func @transform_2(%arg0: i32) -> (i32, i32) {
    %c0_i32 = arith.constant 0 : i32
    %c0_i32_0 = arith.constant 0 : i32
    %c0_i32_1 = arith.constant 0 : i32
    return %c0_i32, %c0_i32_0 : i32, i32
  }
  func.func @transform_3(%arg0: i32) -> (i32, i32) {
    %c0_i32 = arith.constant 0 : i32
    %c0_i32_0 = arith.constant 0 : i32
    %c0_i32_1 = arith.constant 0 : i32
    return %c0_i32, %c0_i32_0 : i32, i32
  }
  func.func @transform_4(%arg0: i32) -> (i32, i32) {
    %c0_i32 = arith.constant 0 : i32
    %c0_i32_0 = arith.constant 0 : i32
    %c0_i32_1 = arith.constant 0 : i32
    return %c0_i32, %c0_i32_0 : i32, i32
  }
  func.func @transform_5(%arg0: i32) -> (i32, i32) {
    %c0_i32 = arith.constant 0 : i32
    %c0_i32_0 = arith.constant 0 : i32
    %c0_i32_1 = arith.constant 0 : i32
    return %c0_i32, %c0_i32_0 : i32, i32
  }
  func.func @transform_6(%arg0: i32) -> (i32, i32) {
    %c0_i32 = arith.constant 0 : i32
    %c0_i32_0 = arith.constant 0 : i32
    %c0_i32_1 = arith.constant 0 : i32
    return %c0_i32, %c0_i32_0 : i32, i32
  }
  func.func @transform_7(%arg0: i32) -> (i32, i32) {
    %c0_i32 = arith.constant 0 : i32
    %c0_i32_0 = arith.constant 0 : i32
    return %arg0, %c0_i32 : i32, i32
  }
  func.func @transform_8(%arg0: i32) -> (i32, i32) {
    %c0_i32 = arith.constant 0 : i32
    %c0_i32_0 = arith.constant 0 : i32
    return %arg0, %c0_i32 : i32, i32
  }
}

</mosaic_0001>

<bundles_post_ra>
// kernel: tpu_custom_call.1
= control target key start
LH: loop header
LB: loop body
LE: loop exit
PB: predicated region body
PF: predicated region fallthrough
CT: control target
= control target key end

     0   :  { %14 = vsyncpa [#allocation3], 0  ;;  %s881_s0 = inlined_call_operand.hbm [shape: f32[8,8], index: 0, kind: input, shape index: {}]   ;;  %s882_s1 = inlined_call_operand.hbm [shape: f32[8,256], index: 1, kind: input, shape index: {}]   ;;  %s883_s2 = inlined_call_operand.vmem [shape: f32[1,256], index: 2, kind: input, shape index: {}]   ;;  %s884_s3 = inlined_call_operand.hbm [shape: bf16[256,128], index: 3, kind: input, shape index: {}]   ;;  %s885_s4 = inlined_call_operand.vmem [shape: f32[1,128], index: 4, kind: input, shape index: {}]   ;;  %s886_s5 = inlined_call_operand.hbm [shape: bf16[128,256], index: 5, kind: input, shape index: {}]   ;;  %s887_s6 = inlined_call_operand.vmem [shape: f32[1,256], index: 6, kind: input, shape index: {}]   ;;  %s888_s7 = inlined_call_operand.hbm [shape: f32[8,128], index: 7, kind: output, shape index: {0}]   ;;  %s889_s8 = inlined_call_operand.vmem [shape: f32[8,1], index: 8, kind: output, shape index: {1}]  }
   0x1   :  { %15 = vsyncpa [#allocation6], 0 }
   0x2   :  { %16 = vsyncpa [#allocation9], 0 }
   0x3   :  { %17 = vsyncpa [#allocation4], 0  ;;  %s753_s27 = smov [#allocation5]   ;;  %s754_s29 = smov [#allocation2]  }
   0x4   :  { %s34_s28 = sshll.u32 %s753_s27, 4  ;;  %s24_s30 = sshll.u32 %s754_s29, 4  ;;  %s35_s28 = int_to_ptr.vmem [resolvable:$true] %s34_s28  ;;  %s25_s30 = int_to_ptr.vmem [resolvable:$true] %s24_s30 }
   0x5   :  { %s635_s11 = scalar_lea.hbm %s882_s1, 256 }
   0x6   :  { %p636_p0 = scmp.ne.s32.totalorder %s882_s1, %s635_s11  ;;  %p639_p1 = scmp.lt.u32.totalorder %s635_s11, %s882_s1 }
   0x8   :  { %p641_p2 = pnand %p639_p1, %p636_p0 }
   0xa   :  { %644 = shalt.err (!%p641_p2)
}
   0xb   :  { %s645_s16 = scalar_lea.vmem %s35_s28, 256  ;;  %p650_p4 = scmp.lt.s32.totalorder %s35_s28, %s35_s28 }
   0xc   :  { %p646_p3 = scmp.ne.s32.totalorder %s35_s28, %s645_s16  ;;  %p651_p5 = scmp.lt.s32.totalorder %s645_s16, %s645_s16 }
   0xe   :  { %p652_p6 = por %p651_p5, %p650_p4 }
  0x10   :  { %p653_p7 = pnand %p652_p6, %p646_p3 }
  0x12   :  { %656 = shalt.err (!%p653_p7)
}
  0x13   :  { %37 = dma.hbm_to_vmem [thread:$0]  %s882_s1, 256, %s35_s28, [#allocation6]  }
  0x14   :  { %s657_s21 = scalar_lea.hbm %s881_s0, 128 }
  0x15   :  { %p658_p8 = scmp.ne.s32.totalorder %s881_s0, %s657_s21  ;;  %p661_p9 = scmp.lt.u32.totalorder %s657_s21, %s881_s0 }
  0x17   :  { %p663_p10 = pnand %p661_p9, %p658_p8 }
  0x19   :  { %666 = shalt.err (!%p663_p10)
}
  0x1a   :  { %s667_s26 = scalar_lea.vmem %s25_s30, 128  ;;  %p672_p12 = scmp.lt.s32.totalorder %s25_s30, %s25_s30 }
  0x1b   :  { %p668_p11 = scmp.ne.s32.totalorder %s25_s30, %s667_s26  ;;  %p673_p13 = scmp.lt.s32.totalorder %s667_s26, %s667_s26 }
  0x1d   :  { %p674_p0 = por %p673_p13, %p672_p12 }
  0x1f   :  { %p675_p1 = pnand %p674_p0, %p668_p11 }
  0x21   :  { %678 = shalt.err (!%p675_p1)
}
  0x22   :  { %27 = dma.hbm_to_vmem [thread:$0]  %s881_s0, 128, %s25_s30, [#allocation3]  }
  0x23   :  { %s755_s28 = smov [#allocation7]   ;;  %s679_s11 = scalar_lea.hbm %s884_s3, 2048 }
  0x24   :  { %s45_s29 = sshll.u32 %s755_s28, 4  ;;  %p680_p2 = scmp.ne.s32.totalorder %s884_s3, %s679_s11  ;;  %s46_s29 = int_to_ptr.vmem [resolvable:$true] %s45_s29 }
  0x25   :  { %p683_p3 = scmp.lt.u32.totalorder %s679_s11, %s884_s3 }
  0x27   :  { %p685_p4 = pnand %p683_p3, %p680_p2 }
  0x29   :  { %688 = shalt.err (!%p685_p4)
}
  0x2a   :  { %s689_s16 = scalar_lea.vmem %s46_s29, 2048  ;;  %p694_p6 = scmp.lt.s32.totalorder %s46_s29, %s46_s29 }
  0x2b   :  { %p690_p5 = scmp.ne.s32.totalorder %s46_s29, %s689_s16  ;;  %p695_p7 = scmp.lt.s32.totalorder %s689_s16, %s689_s16 }
  0x2d   :  { %p696_p8 = por %p695_p7, %p694_p6 }
  0x2f   :  { %p697_p9 = pnand %p696_p8, %p690_p5 }
  0x31   :  { %700 = shalt.err (!%p697_p9)
}
  0x32   :  { %s756_s0 = smov 64   ;;  %s757_s30 = smov 4  }
  0x33   :  { %51 = dma.hbm_to_vmem [thread:$0]  %s884_s3, 2048, %s46_s29, [#allocation6], %s756_s0, %s756_s0, %s757_s30  }
  0x34   :  { %s758_s19 = smov [#allocation8]   ;;  %s701_s23 = scalar_lea.hbm %s886_s5, 2048 }
  0x35   :  { %s59_s20 = sshll.u32 %s758_s19, 4  ;;  %p702_p10 = scmp.ne.s32.totalorder %s886_s5, %s701_s23  ;;  %s60_s20 = int_to_ptr.vmem [resolvable:$true] %s59_s20 }
  0x36   :  { %p705_p11 = scmp.lt.u32.totalorder %s701_s23, %s886_s5 }
  0x38   :  { %p707_p12 = pnand %p705_p11, %p702_p10 }
  0x3a   :  { %710 = shalt.err (!%p707_p12)
}
  0x3b   :  { %s711_s27 = scalar_lea.vmem %s60_s20, 2048  ;;  %p716_p0 = scmp.lt.s32.totalorder %s60_s20, %s60_s20 }
  0x3c   :  { %p712_p13 = scmp.ne.s32.totalorder %s60_s20, %s711_s27  ;;  %p717_p1 = scmp.lt.s32.totalorder %s711_s27, %s711_s27 }
  0x3e   :  { %p718_p2 = por %p717_p1, %p716_p0 }
  0x40   :  { %p719_p3 = pnand %p718_p2, %p712_p13 }
  0x42   :  { %722 = shalt.err (!%p719_p3)
}
  0x43   :  { %s759_s3 = smov 128   ;;  %s760_s28 = smov 8  }
  0x44   :  { %65 = dma.hbm_to_vmem [thread:$0]  %s886_s5, 2048, %s60_s20, [#allocation9], %s759_s3, %s759_s3, %s760_s28  }
  0x45   :  { %745 = dma.done.wait [#allocation3], 128  }
  0x46   :  { %746 = vsyncadd [#allocation3], 4294967168 }
  0x47   :  { %747 = dma.done.wait [#allocation6], 2304  }
  0x48   :  { %748 = vsyncadd [#allocation6], 4294964992 }
  0x49   :  { %749 = dma.done.wait [#allocation9], 2048  }
  0x4a   :  { %750 = vsyncadd [#allocation9], 4294965248  ;;  %v761_v0 = vmov 0.0   ;;  %v83_v1 = vld [vmem:[#allocation5 + $0x8] sm:$0xff]  ;;  %v82_v2 = vld [vmem:[#allocation5] sm:$0xff]  ;;  %vm96_vm0 = vcmask 64512   ;;  %v86_v32 = vlaneseq }
  0x4b   :  { %164 = vmatprep.mubr.f32.mxu0 %v761_v0  ;;  %v81_v3 = vld [vmem:[#allocation2] sm:$0xff]  ;;  %100 = vmatprep.subr.mxu0 %v83_v1  ;;  %v595_v4 = vld [vmem:[#allocation7 + $0x40] sm:$0xff]   ;;  %v599_v8 = vld [vmem:[#allocation7 + $0x50] sm:$0xff]   ;;  %v762_v51 = vmov 0  }
  0x4c   :  { %101 = vmatpush1.msra.mxu0 %v82_v2  ;;  %v596_v5 = vld [vmem:[#allocation7] sm:$0xff]   ;;  %562 = vmatprep.subr.bf16.mxu1 %v595_v4  ;;  %v597_v6 = vld [vmem:[#allocation7 + $0x48] sm:$0xff]   ;;  %v600_v9 = vld [vmem:[#allocation7 + $0x10] sm:$0xff]   ;;  %v87_v33 = vshrl.u32 %v86_v32, 7 }
  0x4d   :  { %528 = vmatmul.mubr.msk.f32.vlgmr.msra.gmra.mrb[0].mxu0 %vm96_vm0, %v81_v3  ;;  %563 = vmatpush3.bf16.msra.mxu1 %v596_v5  ;;  %v598_v7 = vld [vmem:[#allocation7 + $0x8] sm:$0xff]   ;;  %v601_v10 = vld [vmem:[#allocation7 + $0x58] sm:$0xff]   ;;  %v603_v12 = vld [vmem:[#allocation7 + $0x60] sm:$0xff]  }
  0x4e   :  { %564 = vmatprep.subr.bf16.mxu1 %v597_v6  ;;  %v602_v11 = vld [vmem:[#allocation7 + $0x18] sm:$0xff]   ;;  %v604_v13 = vld [vmem:[#allocation7 + $0x20] sm:$0xff]   ;;  %v605_v14 = vld [vmem:[#allocation7 + $0x68] sm:$0xff]   ;;  %v88_v34 = vsub.s32 0, %v87_v33  ;;  %v92_v36 = vsub.s32 1, %v87_v33  ;;  %492 = vmatprep.mubr.bf16.mxu0 %v762_v51 }
  0x4f   :  { %v606_v15 = vld [vmem:[#allocation7 + $0x28] sm:$0xff]   ;;  %v607_v16 = vld [vmem:[#allocation7 + $0x70] sm:$0xff]   ;;  %v609_v18 = vld [vmem:[#allocation7 + $0x78] sm:$0xff]  }
  0x50   :  { %v608_v17 = vld [vmem:[#allocation7 + $0x30] sm:$0xff]   ;;  %v610_v19 = vld [vmem:[#allocation7 + $0x38] sm:$0xff]   ;;  %v611_v20 = vld [vmem:[#allocation8] ss:$8 sps:$4 sm:$0xff]  }
  0x51   :  { %565 = vmatpush3.bf16.msra.mxu1 %v598_v7  ;;  %v613_v21 = vld [vmem:[#allocation8 + $0x4] ss:$8 sps:$4 sm:$0xff]   ;;  %v616_v22 = vld [vmem:[#allocation8 + $0x14] ss:$8 sps:$4 sm:$0xff]   ;;  %v614_v23 = vld [vmem:[#allocation8 + $0x10] ss:$8 sps:$4 sm:$0xff]  }
  0x52   :  { %566 = vmatprep.subr.bf16.mxu1 %v599_v8  ;;  %460 = vmatprep.subr.bf16.mxu0 %v613_v21  ;;  %v619_v24 = vld [vmem:[#allocation8 + $0x24] ss:$8 sps:$4 sm:$0xff]   ;;  %v617_v25 = vld [vmem:[#allocation8 + $0x20] ss:$8 sps:$4 sm:$0xff]   ;;  %v622_v26 = vld [vmem:[#allocation8 + $0x34] ss:$8 sps:$4 sm:$0xff]  }
  0x53   :  { %461 = vmatpush1.bf16.msra.mxu0 %v611_v20  ;;  %v620_v27 = vld [vmem:[#allocation8 + $0x30] ss:$8 sps:$4 sm:$0xff]   ;;  %v625_v28 = vld [vmem:[#allocation8 + $0x44] ss:$8 sps:$4 sm:$0xff]   ;;  %v623_v29 = vld [vmem:[#allocation8 + $0x40] ss:$8 sps:$4 sm:$0xff]  }
  0x54   :  { %462 = vmatprep.subr.bf16.mxu0 %v616_v22  ;;  %v628_v30 = vld [vmem:[#allocation8 + $0x54] ss:$8 sps:$4 sm:$0xff]   ;;  %v626_v31 = vld [vmem:[#allocation8 + $0x50] ss:$8 sps:$4 sm:$0xff]   ;;  %v84_v35 = vld [vmem:[%s883_s2] sm:$0x3] }
  0x55   :  { %567 = vmatpush3.bf16.msra.mxu1 %v600_v9  ;;  %v89_v37 = vrot.slane %v84_v35, %v88_v34  ;;  %v93_v38 = vrot.slane %v84_v35, %v92_v36  ;;  %v631_v47 = vld [vmem:[#allocation8 + $0x64] ss:$8 sps:$4 sm:$0xff]   ;;  %v629_v48 = vld [vmem:[#allocation8 + $0x60] ss:$8 sps:$4 sm:$0xff]   ;;  %v634_v49 = vld [vmem:[#allocation8 + $0x74] ss:$8 sps:$4 sm:$0xff]  }
  0x56   :  { %568 = vmatprep.subr.bf16.mxu1 %v601_v10  ;;  %v632_v50 = vld [vmem:[#allocation8 + $0x70] ss:$8 sps:$4 sm:$0xff]   ;;  %v529_v53 = vld [vmem:[%s885_s4] ss:$0 sm:$0xff]  ;;  %s763_s4 = smov [#allocation10]  }
  0x57   :  { %463 = vmatpush1.bf16.msra.mxu0 %v614_v23  ;;  %v368_v61 = vld [vmem:[%s887_s6] sm:$0x3]  ;;  %s513_s14 = sshll.u32 %s763_s4, 4  ;;  %s514_s14 = int_to_ptr.vmem [resolvable:$true] %s513_s14 }
  0x58   :  { %464 = vmatprep.subr.bf16.mxu0 %v619_v24  ;;  %v373_v62 = vrot.slane %v368_v61, %v88_v34  ;;  %v377_v63 = vrot.slane %v368_v61, %v92_v36  ;;  %s723_s15 = scalar_lea.vmem %s514_s14, 128  ;;  %p728_p5 = scmp.lt.s32.totalorder %s514_s14, %s514_s14 }
  0x59   :  { %569 = vmatpush3.bf16.msra.mxu1 %v602_v11  ;;  %p724_p4 = scmp.ne.s32.totalorder %s514_s14, %s723_s15  ;;  %p729_p6 = scmp.lt.s32.totalorder %s723_s15, %s723_s15 }
  0x5a   :  { %570 = vmatprep.subr.bf16.mxu1 %v603_v12 }
  0x5b   :  { %465 = vmatpush1.bf16.msra.mxu0 %v617_v25  ;;  %p730_p7 = por %p729_p6, %p728_p5 }
  0x5c   :  { %466 = vmatprep.subr.bf16.mxu0 %v622_v26 }
  0x5d   :  { %571 = vmatpush3.bf16.msra.mxu1 %v604_v13  ;;  %p731_p8 = pnand %p730_p7, %p724_p4 }
  0x5e   :  { %572 = vmatprep.subr.bf16.mxu1 %v605_v14 }
  0x5f   :  { %467 = vmatpush1.bf16.msra.mxu0 %v620_v27 }
  0x60   :  { %468 = vmatprep.subr.bf16.mxu0 %v625_v28 }
  0x61   :  { %573 = vmatpush3.bf16.msra.mxu1 %v606_v15 }
  0x62   :  { %574 = vmatprep.subr.bf16.mxu1 %v607_v16 }
  0x63   :  { %469 = vmatpush1.bf16.msra.mxu0 %v623_v29 }
  0x64   :  { %470 = vmatprep.subr.bf16.mxu0 %v628_v30 }
  0x65   :  { %575 = vmatpush3.bf16.msra.mxu1 %v608_v17 }
  0x66   :  { %576 = vmatprep.subr.bf16.mxu1 %v609_v18 }
  0x67   :  { %471 = vmatpush1.bf16.msra.mxu0 %v626_v31 }
  0x68   :  { %472 = vmatprep.subr.bf16.mxu0 %v631_v47 }
  0x69   :  { %577 = vmatpush3.bf16.msra.mxu1 %v610_v19 }
  0x6b   :  { %473 = vmatpush1.bf16.msra.mxu0 %v629_v48 }
  0x6c   :  { %474 = vmatprep.subr.bf16.mxu0 %v634_v49 }
  0x6f   :  { %475 = vmatpush1.bf16.msra.mxu0 %v632_v50 }
 0x120   :  { %v166_v39 = vpop.f32.mrb[0].mxu0 }
 0x121   :  { %v167_v40 = vadd.f32 %v166_v39, %v89_v37  ;;  %v168_v41 = vpop.f32.mrb[1].mxu0 }
 0x122   :  { %v169_v42 = vadd.f32 %v168_v41, %v93_v38 }
 0x123   :  { %v171_v43 = vmax.f32 %v167_v40, 0.0 }
 0x124   :  { %v172_v44 = vmax.f32 %v169_v42, 0.0 }
 0x125   :  { %v173_v46 = vpack.c.bf16 %v171_v43, %v171_v43 }
 0x126   :  { %v174_v45 = vpack.c.bf16 %v172_v44, %v172_v44 }
 0x128   :  { %342 = vmatprep.mubr.bf16.mxu1 %v174_v45 }
 0x129   :  { %343 = vmatmul.mubr.bf16.vlgmr.msra.gmra.mrb[0].mxu1 %v173_v46 }
 0x1fc   :  { %v578_v52 = vpop.f32.mrb[0].mxu1 }
 0x1fd   :  { %v579_v54 = vpop.f32.mrb[1].mxu1 }
 0x1fe   :  { %v580_v55 = vadd.f32 %v579_v54, %v578_v52  ;;  %v581_v56 = vpop.f32.mrb[2].mxu1 }
 0x1ff   :  { %v582_v57 = vpop.f32.mrb[3].mxu1 }
 0x200   :  { %v345_v58 = vadd.f32 %v580_v55, %v529_v53 }
 0x202   :  { %v350_v59 = vmax.f32 %v345_v58, 0.0 }
 0x204   :  { %v351_v60 = vpack.c.bf16 %v350_v59, %v350_v59 }
 0x206   :  { %493 = vmatmul.mubr.bf16.vlgmr.msra.gmra.mrb[4].mxu0 %v351_v60 }
 0x2d9   :  { %v494_v0 = vpop.f32.mrb[4].mxu0 }
 0x2da   :  { %v495_v1 = vadd.f32 %v494_v0, %v373_v62  ;;  %v496_v2 = vpop.f32.mrb[5].mxu0 }
 0x2db   :  { %v497_v3 = vadd.f32 %v496_v2, %v377_v63  ;;  %v498_v4 = vpop.f32.mrb[6].mxu0 }
 0x2dc   :  { %v499_v5 = vpop.f32.mrb[7].mxu0 }
 0x2dd   :  { %v501_v6 = vadd.f32 %v497_v3, %v495_v1  ;;  %503 = vadd.xlane.f32.xlu0 %v497_v3 }
 0x2df   :  { %502 = vst [vmem:[#allocation10] sm:$0xff] %v501_v6 }
 0x2e0   :  { %734 = shalt.err (!%p731_p8)
}
 0x2e1   :  { %s735_s0 = scalar_lea.hbm %s888_s7, 128 }
 0x2e2   :  { %p736_p9 = scmp.ne.s32.totalorder %s888_s7, %s735_s0  ;;  %p739_p10 = scmp.lt.u32.totalorder %s735_s0, %s888_s7 }
 0x2e4   :  { %p741_p11 = pnand %p739_p10, %p736_p9 }
 0x2e6   :  { %744 = shalt.err (!%p741_p11)
}
 0x2e7   :  { %516 = dma.vmem_to_hbm [thread:$0]  %s514_s14, 128, %s888_s7, [#allocation4]   ;;  %vm505_vm1 = vcmask 7168  }
 0x36a   :  { %v504_v7 = vpop.xlane.xlu0 %503 }
 0x36b   :  { %506 = vst.msk [vmem:[%s889_s8] sm:$0xff] %vm505_vm1, %v504_v7 }
 0x36c   :  { %751 = dma.done.wait [#allocation4], 128  }
 0x36d   :  { %752 = vsyncadd [#allocation4], 4294967168 }
 0x36e   :  { %524 = vsyncpa [#allocation3], 1 }
 0x36f   :  { %525 = vsyncpa [#allocation6], 1 }
 0x370   :  { %526 = vsyncpa [#allocation9], 1 }
 0x371   :  { %527 = vsyncpa [#allocation4], 1 }

</bundles_post_ra>
